<compile_context>
chip_gen: v7x
topology: tpu7x:2x2x1
jax: 0.10.0
libtpu: 0.0.40
codegen_flags: <defaults>
</compile_context>

<pallas_src>
import functools

import jax
import jax.numpy as jnp
from jax import lax
from jax.experimental import pallas as pl
from jax.experimental.pallas import tpu as pltpu


def _resblock_kernel(xr_ref, t1_ref, t2_ref, ts_ref,
                     s1_ref, b1_ref, s2_ref, b2_ref, ss_ref, bs_ref,
                     out_ref):
    Nb, Hp, WCin = xr_ref.shape
    H = Hp - 2
    WCout = out_ref.shape[2]

    x = xr_ref[...]                                    # (Nb, H+2, W*Cin) bf16, H-padded

    # ---- conv1 (3x3): 3 row-shifted MXU matmuls vs block-Toeplitz weights ----
    acc1 = jnp.zeros((Nb * H, WCout), jnp.float32)
    for ky in range(3):
        rows = x[:, ky:ky + H, :].reshape(Nb * H, WCin)
        acc1 = acc1 + jnp.dot(rows, t1_ref[ky], preferred_element_type=jnp.float32)

    # ---- BN1 + ReLU (f32 epilogue, lane-dense (1, W*Cout) scale/bias rows) ----
    h1 = jnp.maximum(acc1 * s1_ref[...] + b1_ref[...], 0.0)

    # ---- zero-pad h1 along H only (W padding lives inside the Toeplitz weight) ----
    h1_3d = h1.reshape(Nb, H, WCout)
    zrow = jnp.zeros((Nb, 1, WCout), jnp.float32)
    mid = jnp.concatenate([zrow, h1_3d, zrow], axis=1)   # (Nb, H+2, W*Cout)

    # ---- conv2 (3x3) + BN2 ----
    acc2 = jnp.zeros((Nb * H, WCout), jnp.float32)
    for ky in range(3):
        rows = mid[:, ky:ky + H, :].astype(x.dtype).reshape(Nb * H, WCout)
        acc2 = acc2 + jnp.dot(rows, t2_ref[ky], preferred_element_type=jnp.float32)
    left = acc2 * s2_ref[...] + b2_ref[...]

    # ---- shortcut: 1x1 conv as block-diagonal matmul (identity weight if Cin==Cout) + BN ----
    xin = x[:, 1:1 + H, :].reshape(Nb * H, WCin)
    sc = jnp.dot(xin, ts_ref[...], preferred_element_type=jnp.float32)
    sc = sc * ss_ref[...] + bs_ref[...]

    # ---- residual add + final ReLU, lane-dense output store (last dim = W*Cout) ----
    out = jnp.maximum(left + sc, 0.0)
    out_ref[...] = out.reshape(Nb, H, WCout).astype(out_ref.dtype)


def _block_toeplitz_3x3(w_hwio, W):
    """(3, 3, Ci, Co) HWIO -> (3, W*Ci, W*Co): one block-Toeplitz matrix per ky tap.

    t[ky][j*Ci + ci, wo*Co + co] = w[ky, j - wo + 1, ci, co]  (0 elsewhere),
    which folds the dx taps *and* the zero W-padding into the weight.
    """
    _, _, Ci, Co = w_hwio.shape
    t = jnp.zeros((3, W * Ci, W * Co), w_hwio.dtype)
    for wo in range(W):
        for kx in range(3):
            j = wo + kx - 1
            if 0 <= j < W:
                t = t.at[:, j * Ci:(j + 1) * Ci, wo * Co:(wo + 1) * Co].set(w_hwio[:, kx])
    return t


def _block_diag_1x1(w_io, W):
    """(Ci, Co) -> (W*Ci, W*Co) block-diagonal weight for a 1x1 conv."""
    Ci, Co = w_io.shape
    s = jnp.zeros((W * Ci, W * Co), w_io.dtype)
    for wo in range(W):
        s = s.at[wo * Ci:(wo + 1) * Ci, wo * Co:(wo + 1) * Co].set(w_io)
    return s


@functools.partial(jax.jit, static_argnames=("block_n",))
def resblock_forward(x_nchw, w1, w2, ws, s1, b1, s2, b2, ss, bs, *, block_n=None):
    """ResBlock forward (stride=1, BatchNorm folded to per-channel scale/bias).

    x_nchw: (N, Cin, H, W) f32.  w1: (3,3,Cin,Cout), w2: (3,3,Cout,Cout) HWIO.
    ws: (1,1,Cin,Cout) HWIO, or None for an identity shortcut (requires Cin==Cout).
    Returns (N, Cout, H, W) f32.
    """
    N, Cin, H, W = x_nchw.shape
    Cout = w1.shape[-1]
    Hp = H + 2

    if block_n is None:                       # amortize per-grid-step overhead
        block_n = 1
        for cand in (8, 4, 2):
            if N % cand == 0:
                block_n = min(cand, N)
                break
    assert N % block_n == 0

    # ---- wrapper-side layout plumbing: NCHW -> (N, H+2, W*Cin) rows, bf16 ----
    x_rows = jnp.transpose(x_nchw, (0, 2, 3, 1)).reshape(N, H, W * Cin)
    x_rows = jnp.pad(x_rows, ((0, 0), (1, 1), (0, 0))).astype(jnp.bfloat16)

    # ---- fold 3x3 convs into block-Toeplitz weights (built once, bf16 for MXU) ----
    t1 = _block_toeplitz_3x3(w1, W).astype(jnp.bfloat16)     # (3, W*Cin,  W*Cout)
    t2 = _block_toeplitz_3x3(w2, W).astype(jnp.bfloat16)     # (3, W*Cout, W*Cout)
    if ws is None:                     # identity shortcut: stride==1 and Cin==Cout
        assert Cin == Cout, "identity shortcut requires Cin == Cout"
        ts = jnp.eye(W * Cin, dtype=jnp.bfloat16)
        ss = jnp.ones((Cout,), jnp.float32)
        bs = jnp.zeros((Cout,), jnp.float32)
    else:
        ts = _block_diag_1x1(ws.reshape(Cin, Cout), W).astype(jnp.bfloat16)

    # per-channel BN params tiled across W -> lane-dense (1, W*Cout) epilogue rows
    row = lambda v: jnp.tile(v.astype(jnp.float32), W).reshape(1, W * Cout)

    WCin, WCout = W * Cin, W * Cout
    const3 = lambda n: (0, 0, 0)
    const2 = lambda n: (0, 0)

    out_rows = pl.pallas_call(
        _resblock_kernel,
        out_shape=jax.ShapeDtypeStruct((N, H, WCout), jnp.float32),
        grid_spec=pltpu.PrefetchScalarGridSpec(
            num_scalar_prefetch=0,
            grid=(N // block_n,),
            in_specs=[
                pl.BlockSpec((block_n, Hp, WCin), lambda n: (n, 0, 0)),
                pl.BlockSpec((3, WCin, WCout), const3),
                pl.BlockSpec((3, WCout, WCout), const3),
                pl.BlockSpec((WCin, WCout), const2),
            ] + [pl.BlockSpec((1, WCout), const2)] * 6,
            out_specs=pl.BlockSpec((block_n, H, WCout), lambda n: (n, 0, 0)),
        ),
        compiler_params=pltpu.CompilerParams(
            dimension_semantics=("parallel",)),
    )(x_rows, t1, t2, ts, row(s1), row(b1), row(s2), row(b2), row(ss), row(bs))

    out = out_rows.reshape(N, H, W, Cout)
    return jnp.transpose(out, (0, 3, 1, 2))


def _init_params(key, Cin, Cout, eps=1e-5):
    ks = jax.random.split(key, 15)
    w1 = jax.random.normal(ks[0], (3, 3, Cin, Cout), jnp.float32) * 0.1
    w2 = jax.random.normal(ks[1], (3, 3, Cout, Cout), jnp.float32) * 0.1
    ws = jax.random.normal(ks[2], (1, 1, Cin, Cout), jnp.float32) * 0.1

    def fold_bn(kg, kb, km, kv):
        gamma = 1.0 + 0.1 * jax.random.normal(kg, (Cout,), jnp.float32)
        beta = 0.1 * jax.random.normal(kb, (Cout,), jnp.float32)
        mean = 0.1 * jax.random.normal(km, (Cout,), jnp.float32)
        var = jax.random.uniform(kv, (Cout,), jnp.float32, minval=0.5, maxval=1.5)
        scale = gamma / jnp.sqrt(var + eps)
        bias = beta - mean * scale
        return scale, bias

    s1, b1 = fold_bn(ks[3], ks[4], ks[5], ks[6])
    s2, b2 = fold_bn(ks[7], ks[8], ks[9], ks[10])
    ss, bs = fold_bn(ks[11], ks[12], ks[13], ks[14])
    return w1, w2, ws, s1, b1, s2, b2, ss, bs


def _resblock_ref(x_nchw, w1, w2, ws, s1, b1, s2, b2, ss, bs):
    """Pure-JAX reference (XLA convs) mirroring the kernel's bf16 matmul operands."""
    bf16, f32 = jnp.bfloat16, jnp.float32
    x = jnp.transpose(x_nchw, (0, 2, 3, 1))
    xb = x.astype(bf16)
    dn = ('NHWC', 'HWIO', 'NHWC')
    c1 = lax.conv_general_dilated(xb, w1.astype(bf16), (1, 1), 'SAME',
                                  dimension_numbers=dn, preferred_element_type=f32)
    h1 = jnp.maximum(c1 * s1 + b1, 0.0)
    c2 = lax.conv_general_dilated(h1.astype(bf16), w2.astype(bf16), (1, 1), 'SAME',
                                  dimension_numbers=dn, preferred_element_type=f32)
    left = c2 * s2 + b2
    if ws is None:
        sc = xb.astype(f32)
    else:
        sc = lax.conv_general_dilated(xb, ws.astype(bf16), (1, 1), 'VALID',
                                      dimension_numbers=dn, preferred_element_type=f32)
        sc = sc * ss + bs
    out = jnp.maximum(left + sc, 0.0)
    return jnp.transpose(out, (0, 3, 1, 2))


if __name__ == "__main__":
    # Case 1: Cin != Cout -> projection shortcut (1x1 conv + BN).
    N, Cin, Cout, H, W = 2, 4, 8, 16, 16
    key = jax.random.PRNGKey(0)
    kx, kp = jax.random.split(key)
    x = jax.random.normal(kx, (N, Cin, H, W), jnp.float32)
    params = _init_params(kp, Cin, Cout)

    out = jax.block_until_ready(resblock_forward(x, *params))
    ref = _resblock_ref(x, *params)
    assert out.shape == (N, Cout, H, W)
    assert jnp.allclose(out, ref, atol=5e-3, rtol=5e-3), \
        float(jnp.max(jnp.abs(out - ref)))

    # Case 2: Cin == Cout, stride == 1 -> identity shortcut (ws=None), as in PyTorch.
    N2, C2, H2, W2 = 2, 8, 16, 16
    k2x, k2p = jax.random.split(jax.random.PRNGKey(1))
    x2 = jax.random.normal(k2x, (N2, C2, H2, W2), jnp.float32)
    w1b, w2b, _, s1b, b1b, s2b, b2b, _, _ = _init_params(k2p, C2, C2)
    out2 = jax.block_until_ready(
        resblock_forward(x2, w1b, w2b, None, s1b, b1b, s2b, b2b, None, None))
    ref2 = _resblock_ref(x2, w1b, w2b, None, s1b, b1b, s2b, b2b, None, None)
    assert out2.shape == (N2, C2, H2, W2)
    assert jnp.allclose(out2, ref2, atol=5e-3, rtol=5e-3), \
        float(jnp.max(jnp.abs(out2 - ref2)))

    print("KERNEL_OK")
</pallas_src>

<mosaic_0001>
module attributes {stable_mosaic.version = 11 : i64} {
  func.func @_resblock_kernel(%arg0: i32, %arg1: memref<2x18x64xbf16, #tpu.memory_space<vmem>>, %arg2: memref<3x64x128xbf16, #tpu.memory_space<vmem>>, %arg3: memref<3x128x128xbf16, #tpu.memory_space<vmem>>, %arg4: memref<64x128xbf16, #tpu.memory_space<vmem>>, %arg5: memref<1x128xf32, #tpu.memory_space<vmem>>, %arg6: memref<1x128xf32, #tpu.memory_space<vmem>>, %arg7: memref<1x128xf32, #tpu.memory_space<vmem>>, %arg8: memref<1x128xf32, #tpu.memory_space<vmem>>, %arg9: memref<1x128xf32, #tpu.memory_space<vmem>>, %arg10: memref<1x128xf32, #tpu.memory_space<vmem>>, %arg11: memref<2x16x128xf32, #tpu.memory_space<vmem>>) attributes {dimension_semantics = [#tpu.dimension_semantics<parallel>], iteration_bounds = array<i64: 1>, scalar_prefetch = 0 : i64, scratch_operands = 0 : i64, tpu.core_type = #tpu.core_type<tc>, window_params = [{transform_indices = @transform_0, window_bounds = array<i64: 2, 18, 64>}, {pipeline_mode = #tpu.pipeline_mode<synchronous>, transform_indices = @transform_1, window_bounds = array<i64: 3, 64, 128>}, {pipeline_mode = #tpu.pipeline_mode<synchronous>, transform_indices = @transform_2, window_bounds = array<i64: 3, 128, 128>}, {pipeline_mode = #tpu.pipeline_mode<synchronous>, transform_indices = @transform_3, window_bounds = array<i64: 64, 128>}, {pipeline_mode = #tpu.pipeline_mode<synchronous>, transform_indices = @transform_4, window_bounds = array<i64: 1, 128>}, {pipeline_mode = #tpu.pipeline_mode<synchronous>, transform_indices = @transform_5, window_bounds = array<i64: 1, 128>}, {pipeline_mode = #tpu.pipeline_mode<synchronous>, transform_indices = @transform_6, window_bounds = array<i64: 1, 128>}, {pipeline_mode = #tpu.pipeline_mode<synchronous>, transform_indices = @transform_7, window_bounds = array<i64: 1, 128>}, {pipeline_mode = #tpu.pipeline_mode<synchronous>, transform_indices = @transform_8, window_bounds = array<i64: 1, 128>}, {pipeline_mode = #tpu.pipeline_mode<synchronous>, transform_indices = @transform_9, window_bounds = array<i64: 1, 128>}, {transform_indices = @transform_10, window_bounds = array<i64: 2, 16, 128>}]} {
    %c0 = arith.constant 0 : index
    %c0_0 = arith.constant 0 : index
    %c0_1 = arith.constant 0 : index
    %0 = vector.load %arg1[%c0, %c0_0, %c0_1] : memref<2x18x64xbf16, #tpu.memory_space<vmem>>, vector<2x18x64xbf16>
    %cst = arith.constant 0.000000e+00 : f32
    %1 = vector.broadcast %cst : f32 to vector<32x128xf32>
    %2 = vector.extract_strided_slice %0 {offsets = [0, 0, 0], sizes = [2, 16, 64], strides = [1, 1, 1]} : vector<2x18x64xbf16> to vector<2x16x64xbf16>
    %3 = vector.shape_cast %2 : vector<2x16x64xbf16> to vector<32x64xbf16>
    %c0_2 = arith.constant 0 : index
    %c0_3 = arith.constant 0 : index
    %c0_4 = arith.constant 0 : index
    %4 = vector.load %arg2[%c0_2, %c0_3, %c0_4] : memref<3x64x128xbf16, #tpu.memory_space<vmem>>, vector<1x64x128xbf16>
    %5 = vector.shape_cast %4 : vector<1x64x128xbf16> to vector<64x128xbf16>
    %cst_5 = arith.constant dense<0.000000e+00> : vector<32x128xf32>
    %6 = tpu.matmul %3, %5, %cst_5 {dimension_numbers = #tpu.dot_dimension_numbers<[1], [0], [0], [1], [0, 0, 1, 1], [], []>} : vector<32x64xbf16>, vector<64x128xbf16>, vector<32x128xf32> -> vector<32x128xf32>
    %7 = arith.addf %1, %6 : vector<32x128xf32>
    %8 = vector.extract_strided_slice %0 {offsets = [0, 1, 0], sizes = [2, 16, 64], strides = [1, 1, 1]} : vector<2x18x64xbf16> to vector<2x16x64xbf16>
    %9 = vector.shape_cast %8 : vector<2x16x64xbf16> to vector<32x64xbf16>
    %c1 = arith.constant 1 : index
    %c0_6 = arith.constant 0 : index
    %c0_7 = arith.constant 0 : index
    %10 = vector.load %arg2[%c1, %c0_6, %c0_7] : memref<3x64x128xbf16, #tpu.memory_space<vmem>>, vector<1x64x128xbf16>
    %11 = vector.shape_cast %10 : vector<1x64x128xbf16> to vector<64x128xbf16>
    %cst_8 = arith.constant dense<0.000000e+00> : vector<32x128xf32>
    %12 = tpu.matmul %9, %11, %cst_8 {dimension_numbers = #tpu.dot_dimension_numbers<[1], [0], [0], [1], [0, 0, 1, 1], [], []>} : vector<32x64xbf16>, vector<64x128xbf16>, vector<32x128xf32> -> vector<32x128xf32>
    %13 = arith.addf %7, %12 : vector<32x128xf32>
    %14 = vector.extract_strided_slice %0 {offsets = [0, 2, 0], sizes = [2, 16, 64], strides = [1, 1, 1]} : vector<2x18x64xbf16> to vector<2x16x64xbf16>
    %15 = vector.shape_cast %14 : vector<2x16x64xbf16> to vector<32x64xbf16>
    %c2 = arith.constant 2 : index
    %c0_9 = arith.constant 0 : index
    %c0_10 = arith.constant 0 : index
    %16 = vector.load %arg2[%c2, %c0_9, %c0_10] : memref<3x64x128xbf16, #tpu.memory_space<vmem>>, vector<1x64x128xbf16>
    %17 = vector.shape_cast %16 : vector<1x64x128xbf16> to vector<64x128xbf16>
    %cst_11 = arith.constant dense<0.000000e+00> : vector<32x128xf32>
    %18 = tpu.matmul %15, %17, %cst_11 {dimension_numbers = #tpu.dot_dimension_numbers<[1], [0], [0], [1], [0, 0, 1, 1], [], []>} : vector<32x64xbf16>, vector<64x128xbf16>, vector<32x128xf32> -> vector<32x128xf32>
    %19 = arith.addf %13, %18 : vector<32x128xf32>
    %c0_12 = arith.constant 0 : index
    %c0_13 = arith.constant 0 : index
    %20 = vector.load %arg5[%c0_12, %c0_13] : memref<1x128xf32, #tpu.memory_space<vmem>>, vector<1x128xf32>
    %21 = vector.broadcast %20 : vector<1x128xf32> to vector<32x128xf32>
    %22 = arith.mulf %19, %21 : vector<32x128xf32>
    %c0_14 = arith.constant 0 : index
    %c0_15 = arith.constant 0 : index
    %23 = vector.load %arg6[%c0_14, %c0_15] : memref<1x128xf32, #tpu.memory_space<vmem>>, vector<1x128xf32>
    %24 = vector.broadcast %23 : vector<1x128xf32> to vector<32x128xf32>
    %25 = arith.addf %22, %24 : vector<32x128xf32>
    %cst_16 = arith.constant 0.000000e+00 : f32
    %26 = vector.broadcast %cst_16 : f32 to vector<32x128xf32>
    %27 = arith.maximumf %25, %26 : vector<32x128xf32>
    %28 = vector.shape_cast %27 : vector<32x128xf32> to vector<2x16x128xf32>
    %cst_17 = arith.constant 0.000000e+00 : f32
    %29 = vector.broadcast %cst_17 : f32 to vector<2x1x128xf32>
    %30 = tpu.concatenate %29, %28, %29 in 1 : vector<2x1x128xf32>, vector<2x16x128xf32>, vector<2x1x128xf32> -> vector<2x18x128xf32>
    %cst_18 = arith.constant 0.000000e+00 : f32
    %31 = vector.broadcast %cst_18 : f32 to vector<32x128xf32>
    %32 = vector.extract_strided_slice %30 {offsets = [0, 0, 0], sizes = [2, 16, 128], strides = [1, 1, 1]} : vector<2x18x128xf32> to vector<2x16x128xf32>
    %33 = arith.truncf %32 : vector<2x16x128xf32> to vector<2x16x128xbf16>
    %34 = vector.shape_cast %33 : vector<2x16x128xbf16> to vector<32x128xbf16>
    %c0_19 = arith.constant 0 : index
    %c0_20 = arith.constant 0 : index
    %c0_21 = arith.constant 0 : index
    %35 = vector.load %arg3[%c0_19, %c0_20, %c0_21] : memref<3x128x128xbf16, #tpu.memory_space<vmem>>, vector<1x128x128xbf16>
    %36 = vector.shape_cast %35 : vector<1x128x128xbf16> to vector<128x128xbf16>
    %cst_22 = arith.constant dense<0.000000e+00> : vector<32x128xf32>
    %37 = tpu.matmul %34, %36, %cst_22 {dimension_numbers = #tpu.dot_dimension_numbers<[1], [0], [0], [1], [0, 0, 1, 1], [], []>} : vector<32x128xbf16>, vector<128x128xbf16>, vector<32x128xf32> -> vector<32x128xf32>
    %38 = arith.addf %31, %37 : vector<32x128xf32>
    %39 = vector.extract_strided_slice %30 {offsets = [0, 1, 0], sizes = [2, 16, 128], strides = [1, 1, 1]} : vector<2x18x128xf32> to vector<2x16x128xf32>
    %40 = arith.truncf %39 : vector<2x16x128xf32> to vector<2x16x128xbf16>
    %41 = vector.shape_cast %40 : vector<2x16x128xbf16> to vector<32x128xbf16>
    %c1_23 = arith.constant 1 : index
    %c0_24 = arith.constant 0 : index
    %c0_25 = arith.constant 0 : index
    %42 = vector.load %arg3[%c1_23, %c0_24, %c0_25] : memref<3x128x128xbf16, #tpu.memory_space<vmem>>, vector<1x128x128xbf16>
    %43 = vector.shape_cast %42 : vector<1x128x128xbf16> to vector<128x128xbf16>
    %cst_26 = arith.constant dense<0.000000e+00> : vector<32x128xf32>
    %44 = tpu.matmul %41, %43, %cst_26 {dimension_numbers = #tpu.dot_dimension_numbers<[1], [0], [0], [1], [0, 0, 1, 1], [], []>} : vector<32x128xbf16>, vector<128x128xbf16>, vector<32x128xf32> -> vector<32x128xf32>
    %45 = arith.addf %38, %44 : vector<32x128xf32>
    %46 = vector.extract_strided_slice %30 {offsets = [0, 2, 0], sizes = [2, 16, 128], strides = [1, 1, 1]} : vector<2x18x128xf32> to vector<2x16x128xf32>
    %47 = arith.truncf %46 : vector<2x16x128xf32> to vector<2x16x128xbf16>
    %48 = vector.shape_cast %47 : vector<2x16x128xbf16> to vector<32x128xbf16>
    %c2_27 = arith.constant 2 : index
    %c0_28 = arith.constant 0 : index
    %c0_29 = arith.constant 0 : index
    %49 = vector.load %arg3[%c2_27, %c0_28, %c0_29] : memref<3x128x128xbf16, #tpu.memory_space<vmem>>, vector<1x128x128xbf16>
    %50 = vector.shape_cast %49 : vector<1x128x128xbf16> to vector<128x128xbf16>
    %cst_30 = arith.constant dense<0.000000e+00> : vector<32x128xf32>
    %51 = tpu.matmul %48, %50, %cst_30 {dimension_numbers = #tpu.dot_dimension_numbers<[1], [0], [0], [1], [0, 0, 1, 1], [], []>} : vector<32x128xbf16>, vector<128x128xbf16>, vector<32x128xf32> -> vector<32x128xf32>
    %52 = arith.addf %45, %51 : vector<32x128xf32>
    %c0_31 = arith.constant 0 : index
    %c0_32 = arith.constant 0 : index
    %53 = vector.load %arg7[%c0_31, %c0_32] : memref<1x128xf32, #tpu.memory_space<vmem>>, vector<1x128xf32>
    %54 = vector.broadcast %53 : vector<1x128xf32> to vector<32x128xf32>
    %55 = arith.mulf %52, %54 : vector<32x128xf32>
    %c0_33 = arith.constant 0 : index
    %c0_34 = arith.constant 0 : index
    %56 = vector.load %arg8[%c0_33, %c0_34] : memref<1x128xf32, #tpu.memory_space<vmem>>, vector<1x128xf32>
    %57 = vector.broadcast %56 : vector<1x128xf32> to vector<32x128xf32>
    %58 = arith.addf %55, %57 : vector<32x128xf32>
    %59 = vector.extract_strided_slice %0 {offsets = [0, 1, 0], sizes = [2, 16, 64], strides = [1, 1, 1]} : vector<2x18x64xbf16> to vector<2x16x64xbf16>
    %60 = vector.shape_cast %59 : vector<2x16x64xbf16> to vector<32x64xbf16>
    %c0_35 = arith.constant 0 : index
    %c0_36 = arith.constant 0 : index
    %61 = vector.load %arg4[%c0_35, %c0_36] : memref<64x128xbf16, #tpu.memory_space<vmem>>, vector<64x128xbf16>
    %cst_37 = arith.constant dense<0.000000e+00> : vector<32x128xf32>
    %62 = tpu.matmul %60, %61, %cst_37 {dimension_numbers = #tpu.dot_dimension_numbers<[1], [0], [0], [1], [0, 0, 1, 1], [], []>} : vector<32x64xbf16>, vector<64x128xbf16>, vector<32x128xf32> -> vector<32x128xf32>
    %c0_38 = arith.constant 0 : index
    %c0_39 = arith.constant 0 : index
    %63 = vector.load %arg9[%c0_38, %c0_39] : memref<1x128xf32, #tpu.memory_space<vmem>>, vector<1x128xf32>
    %64 = vector.broadcast %63 : vector<1x128xf32> to vector<32x128xf32>
    %65 = arith.mulf %62, %64 : vector<32x128xf32>
    %c0_40 = arith.constant 0 : index
    %c0_41 = arith.constant 0 : index
    %66 = vector.load %arg10[%c0_40, %c0_41] : memref<1x128xf32, #tpu.memory_space<vmem>>, vector<1x128xf32>
    %67 = vector.broadcast %66 : vector<1x128xf32> to vector<32x128xf32>
    %68 = arith.addf %65, %67 : vector<32x128xf32>
    %69 = arith.addf %58, %68 : vector<32x128xf32>
    %cst_42 = arith.constant 0.000000e+00 : f32
    %70 = vector.broadcast %cst_42 : f32 to vector<32x128xf32>
    %71 = arith.maximumf %69, %70 : vector<32x128xf32>
    %72 = vector.shape_cast %71 : vector<32x128xf32> to vector<2x16x128xf32>
    %c0_43 = arith.constant 0 : index
    %c0_44 = arith.constant 0 : index
    %c0_45 = arith.constant 0 : index
    %73 = vector.load %arg11[%c0_43, %c0_44, %c0_45] : memref<2x16x128xf32, #tpu.memory_space<vmem>>, vector<2x16x128xf32>
    tpu.vector_store %arg11[%c0_43, %c0_44, %c0_45], %72 {strides = array<i32>} : memref<2x16x128xf32, #tpu.memory_space<vmem>>, vector<2x16x128xf32>,
    return
  }
  func.func @transform_0(%arg0: i32) -> (i32, i32, i32) {
    %c0_i32 = arith.constant 0 : i32
    %c0_i32_0 = arith.constant 0 : i32
    %c0_i32_1 = arith.constant 0 : i32
    return %arg0, %c0_i32, %c0_i32_0 : i32, i32, i32
  }
  func.func @transform_1(%arg0: i32) -> (i32, i32, i32) {
    %c0_i32 = arith.constant 0 : i32
    %c0_i32_0 = arith.constant 0 : i32
    %c0_i32_1 = arith.constant 0 : i32
    %c0_i32_2 = arith.constant 0 : i32
    return %c0_i32, %c0_i32_0, %c0_i32_1 : i32, i32, i32
  }
  func.func @transform_2(%arg0: i32) -> (i32, i32, i32) {
    %c0_i32 = arith.constant 0 : i32
    %c0_i32_0 = arith.constant 0 : i32
    %c0_i32_1 = arith.constant 0 : i32
    %c0_i32_2 = arith.constant 0 : i32
    return %c0_i32, %c0_i32_0, %c0_i32_1 : i32, i32, i32
  }
  func.func @transform_3(%arg0: i32) -> (i32, i32) {
    %c0_i32 = arith.constant 0 : i32
    %c0_i32_0 = arith.constant 0 : i32
    %c0_i32_1 = arith.constant 0 : i32
    return %c0_i32, %c0_i32_0 : i32, i32
  }
  func.func @transform_4(%arg0: i32) -> (i32, i32) {
    %c0_i32 = arith.constant 0 : i32
    %c0_i32_0 = arith.constant 0 : i32
    %c0_i32_1 = arith.constant 0 : i32
    return %c0_i32, %c0_i32_0 : i32, i32
  }
  func.func @transform_5(%arg0: i32) -> (i32, i32) {
    %c0_i32 = arith.constant 0 : i32
    %c0_i32_0 = arith.constant 0 : i32
    %c0_i32_1 = arith.constant 0 : i32
    return %c0_i32, %c0_i32_0 : i32, i32
  }
  func.func @transform_6(%arg0: i32) -> (i32, i32) {
    %c0_i32 = arith.constant 0 : i32
    %c0_i32_0 = arith.constant 0 : i32
    %c0_i32_1 = arith.constant 0 : i32
    return %c0_i32, %c0_i32_0 : i32, i32
  }
  func.func @transform_7(%arg0: i32) -> (i32, i32) {
    %c0_i32 = arith.constant 0 : i32
    %c0_i32_0 = arith.constant 0 : i32
    %c0_i32_1 = arith.constant 0 : i32
    return %c0_i32, %c0_i32_0 : i32, i32
  }
  func.func @transform_8(%arg0: i32) -> (i32, i32) {
    %c0_i32 = arith.constant 0 : i32
    %c0_i32_0 = arith.constant 0 : i32
    %c0_i32_1 = arith.constant 0 : i32
    return %c0_i32, %c0_i32_0 : i32, i32
  }
  func.func @transform_9(%arg0: i32) -> (i32, i32) {
    %c0_i32 = arith.constant 0 : i32
    %c0_i32_0 = arith.constant 0 : i32
    %c0_i32_1 = arith.constant 0 : i32
    return %c0_i32, %c0_i32_0 : i32, i32
  }
  func.func @transform_10(%arg0: i32) -> (i32, i32, i32) {
    %c0_i32 = arith.constant 0 : i32
    %c0_i32_0 = arith.constant 0 : i32
    %c0_i32_1 = arith.constant 0 : i32
    return %arg0, %c0_i32, %c0_i32_0 : i32, i32, i32
  }
}

</mosaic_0001>

<bundles_post_ra>
// kernel: tile.33
= control target key start
LH: loop header
LB: loop body
LE: loop exit
PB: predicated region body
PF: predicated region fallthrough
CT: control target
= control target key end

     0   :  { %s28_s0 = inlined_call_operand.vmem [shape: f32[8], index: 0, kind: input, shape index: {}]   ;;  %s29_s1 = inlined_call_operand.vmem [shape: f32[16,8], index: 1, kind: output, shape index: {}]  }
   0x1   :  { %v4_v0 = vld [vmem:[%s28_s0] ss:$0 sm:$0xff] }
   0x2   :  { %5 = vst [vmem:[%s29_s1] sm:$0xff] %v4_v0  ;;  %8 = vst [vmem:[%s29_s1 + $0x8] sm:$0xff] %v4_v0 }

// kernel: tile.34
= control target key start
LH: loop header
LB: loop body
LE: loop exit
PB: predicated region body
PF: predicated region fallthrough
CT: control target
= control target key end

     0   :  { %s131_s10 = smov 120   ;;  %s132_s11 = smov 104   ;;  %vm3_vm0 = vcmask 64512   ;;  %vm9_vm1 = vcmask 1048512   ;;  %vm15_vm2 = vcmask 982912   ;;  %vm21_vm3 = vcmask 917312   ;;  %s207_s0 = inlined_call_operand.vmem [shape: f32[16,8], index: 0, kind: input, shape index: {}]   ;;  %s208_s1 = inlined_call_operand.vmem [shape: f32[1,128], index: 1, kind: output, shape index: {}]  }
   0x1   :  { %v101_v0 = vld [vmem:[%s207_s0 + $0xf] sm:$0x1]   ;;  %v103_v1 = vld [vmem:[%s207_s0 + $0xd] sm:$0x1]   ;;  %v102_v2 = vld [vmem:[%s207_s0 + $0xe] sm:$0x1]  }
   0x2   :  { %7 = vrot.lane.b32.xlu0 %v101_v0, %s131_s10  ;;  %19 = vrot.lane.b32.xlu1 %v103_v1, %s132_s11  ;;  %v104_v3 = vld [vmem:[%s207_s0 + $0xc] sm:$0x1]   ;;  %s133_s16 = smov 112   ;;  %s134_s17 = smov 96   ;;  %v105_v4 = vld [vmem:[%s207_s0 + $0xb] sm:$0x1]  }
   0x3   :  { %v106_v5 = vld [vmem:[%s207_s0 + $0xa] sm:$0x1]   ;;  %v2_v6 = vld [vmem:[%s207_s0] sm:$0x1]   ;;  %s135_s24 = smov 88   ;;  %s136_s25 = smov 80  }
   0x4   :  { %4 = vst.msk [vmem:[#allocation0] sm:$0x1] %vm3_vm0, %v2_v6   ;;  %v107_v7 = vld [vmem:[%s207_s0 + $0x9] sm:$0x1]   ;;  %v108_v8 = vld [vmem:[%s207_s0 + $0x8] sm:$0x1]  }
   0x5   :  { %s137_s30 = smov 72   ;;  %s138_s2 = smov 64   ;;  %v109_v9 = vld [vmem:[%s207_s0 + $0x7] sm:$0x1]   ;;  %v110_v10 = vld [vmem:[%s207_s0 + $0x6] sm:$0x1]  }
   0x6   :  { %13 = vrot.lane.b32.xlu0 %v102_v2, %s133_s16  ;;  %25 = vrot.lane.b32.xlu1 %v104_v3, %s134_s17  ;;  %s139_s7 = smov 56   ;;  %s140_s8 = smov 48   ;;  %v111_v11 = vld [vmem:[%s207_s0 + $0x5] sm:$0x1]   ;;  %v112_v12 = vld [vmem:[%s207_s0 + $0x4] sm:$0x1]  }
   0x7   :  { %s141_s13 = smov 40   ;;  %s142_s14 = smov 32   ;;  %v113_v13 = vld [vmem:[%s207_s0 + $0x3] sm:$0x1]   ;;  %v114_v14 = vld [vmem:[%s207_s0 + $0x2] sm:$0x1]  }
   0x8   :  { %s143_s19 = smov 24   ;;  %s144_s20 = smov 16   ;;  %v115_v15 = vld [vmem:[%s207_s0 + $0x1] sm:$0x1]   ;;  %vm27_vm4 = vcmask 851712   ;;  %vm33_vm5 = vcmask 786112  }
   0x9   :  { %s145_s0 = smov 8   ;;  %vm39_vm6 = vcmask 720512   ;;  %vm45_vm7 = vcmask 654912   ;;  %vm51_vm8 = vcmask 589312   ;;  %vm57_vm9 = vcmask 523712  }
   0xa   :  { %31 = vrot.lane.b32.xlu0 %v105_v4, %s135_s24  ;;  %37 = vrot.lane.b32.xlu1 %v106_v5, %s136_s25  ;;  %vm63_vm10 = vcmask 458112   ;;  %vm69_vm11 = vcmask 392512   ;;  %vm75_vm12 = vcmask 326912   ;;  %vm81_vm13 = vcmask 261312  }
   0xb   :  { %vm87_vm14 = vcmask 195712   ;;  %vm93_vm15 = vcmask 130112  }
   0xe   :  { %43 = vrot.lane.b32.xlu0 %v107_v7, %s137_s30  ;;  %49 = vrot.lane.b32.xlu1 %v108_v8, %s138_s2 }
  0x12   :  { %55 = vrot.lane.b32.xlu0 %v109_v9, %s139_s7  ;;  %61 = vrot.lane.b32.xlu1 %v110_v10, %s140_s8 }
  0x16   :  { %67 = vrot.lane.b32.xlu0 %v111_v11, %s141_s13  ;;  %73 = vrot.lane.b32.xlu1 %v112_v12, %s142_s14 }
  0x1a   :  { %79 = vrot.lane.b32.xlu0 %v113_v13, %s143_s19  ;;  %85 = vrot.lane.b32.xlu1 %v114_v14, %s144_s20 }
  0x1e   :  { %91 = vrot.lane.b32.xlu0 %v115_v15, %s145_s0 }
  0x74   :  { %v8_v16 = vpop.permute.xlu0 %7   ;;  %v20_v17 = vpop.permute.xlu1 %19  }
  0x75   :  { %10 = vst.msk [vmem:[#allocation0] sm:$0x1] %vm9_vm1, %v8_v16  }
  0x78   :  { %v14_v18 = vpop.permute.xlu0 %13   ;;  %v26_v19 = vpop.permute.xlu1 %25  }
  0x79   :  { %16 = vst.msk [vmem:[#allocation0] sm:$0x1] %vm15_vm2, %v14_v18  }
  0x7a   :  { %22 = vst.msk [vmem:[#allocation0] sm:$0x1] %vm21_vm3, %v20_v17  }
  0x7b   :  { %28 = vst.msk [vmem:[#allocation0] sm:$0x1] %vm27_vm4, %v26_v19  }
  0x7c   :  { %v32_v20 = vpop.permute.xlu0 %31   ;;  %v38_v21 = vpop.permute.xlu1 %37  }
  0x7d   :  { %34 = vst.msk [vmem:[#allocation0] sm:$0x1] %vm33_vm5, %v32_v20  }
  0x7e   :  { %40 = vst.msk [vmem:[#allocation0] sm:$0x1] %vm39_vm6, %v38_v21  }
  0x80   :  { %v44_v22 = vpop.permute.xlu0 %43   ;;  %v50_v23 = vpop.permute.xlu1 %49  }
  0x81   :  { %46 = vst.msk [vmem:[#allocation0] sm:$0x1] %vm45_vm7, %v44_v22  }
  0x82   :  { %52 = vst.msk [vmem:[#allocation0] sm:$0x1] %vm51_vm8, %v50_v23  }
  0x84   :  { %v56_v24 = vpop.permute.xlu0 %55   ;;  %v62_v25 = vpop.permute.xlu1 %61  }
  0x85   :  { %58 = vst.msk [vmem:[#allocation0] sm:$0x1] %vm57_vm9, %v56_v24  }
  0x86   :  { %64 = vst.msk [vmem:[#allocation0] sm:$0x1] %vm63_vm10, %v62_v25  }
  0x88   :  { %v68_v26 = vpop.permute.xlu0 %67   ;;  %v74_v27 = vpop.permute.xlu1 %73  }
  0x89   :  { %70 = vst.msk [vmem:[#allocation0] sm:$0x1] %vm69_vm11, %v68_v26  }
  0x8a   :  { %76 = vst.msk [vmem:[#allocation0] sm:$0x1] %vm75_vm12, %v74_v27  }
  0x8c   :  { %v80_v28 = vpop.permute.xlu0 %79   ;;  %v86_v29 = vpop.permute.xlu1 %85  }
  0x8d   :  { %82 = vst.msk [vmem:[#allocation0] sm:$0x1] %vm81_vm13, %v80_v28  }
  0x8e   :  { %88 = vst.msk [vmem:[#allocation0] sm:$0x1] %vm87_vm14, %v86_v29  }
  0x90   :  { %v92_v30 = vpop.permute.xlu0 %91  }
  0x91   :  { %94 = vst.msk [vmem:[#allocation0] sm:$0x1] %vm93_vm15, %v92_v30  }
  0x98   :  { %v98_v31 = vld [vmem:[#allocation0] sm:$0x1] }
  0x99   :  { %100 = vst [vmem:[%s208_s1] sm:$0x1] %v98_v31 }

// kernel: resblock_forward.1
= control target key start
LH: loop header
LB: loop body
LE: loop exit
PB: predicated region body
PF: predicated region fallthrough
CT: control target
= control target key end

     0   :  { %vm50_vm0 = vsmask.f32 3328  ;;  %vm51_vm1 = vsmask.f32 7440  ;;  %vm140_vm3 = vcmask 523264   ;;  %vm287_vm4 = vcmask 1042432   ;;  %s1646_s1 = inlined_call_operand.vmem [shape: bf16[3,64,128], index: 1, kind: input, shape index: {}]   ;;  %s1647_s0 = inlined_call_operand.vmem [shape: bf16[2,18,64], index: 0, kind: input, shape index: {}]   ;;  %s1648_s2 = inlined_call_operand.vmem [shape: bf16[3,128,128], index: 2, kind: input, shape index: {}]   ;;  %s1649_s3 = inlined_call_operand.vmem [shape: bf16[64,128], index: 3, kind: input, shape index: {}]   ;;  %s1650_s4 = inlined_call_operand.vmem [shape: f32[1,128], index: 4, kind: input, shape index: {}]   ;;  %s1651_s5 = inlined_call_operand.vmem [shape: f32[1,128], index: 5, kind: input, shape index: {}]   ;;  %s1652_s8 = inlined_call_operand.vmem [shape: f32[1,128], index: 8, kind: input, shape index: {}]   ;;  %s1653_s9 = inlined_call_operand.vmem [shape: f32[1,128], index: 9, kind: input, shape index: {}]   ;;  %s1654_s6 = inlined_call_operand.vmem [shape: f32[1,128], index: 6, kind: input, shape index: {}]   ;;  %s1655_s7 = inlined_call_operand.vmem [shape: f32[1,128], index: 7, kind: input, shape index: {}]   ;;  %s1656_s10 = inlined_call_operand.vmem [shape: f32[2,16,128], index: 10, kind: output, shape index: {}]  }
   0x1   :  { %v1276_v0 = vld [vmem:[%s1646_s1 + $0x20] sm:$0xff]   ;;  %v1277_v1 = vld [vmem:[%s1646_s1 + $0x28] sm:$0xff]   ;;  %v1278_v2 = vld [vmem:[%s1646_s1 + $0x30] sm:$0xff]   ;;  %vm288_vm5 = vcmask 1046532   ;;  %vm432_vm7 = vcmask 1040384   ;;  %vm711_vm8 = vcmask 1046528  }
   0x2   :  { %1151 = vmatprep.subr.bf16.mxu0 %v1276_v0  ;;  %v1386_v3 = vld [vmem:[%s1647_s0] sm:$0xf]  ;;  %v1391_v4 = vld [vmem:[%s1647_s0 + $0x4] sm:$0xf]  ;;  %v1396_v5 = vld [vmem:[%s1647_s0 + $0x8] sm:$0x1] }
   0x3   :  { %1152 = vmatpush3.bf16.msra.mxu0 %v1276_v0  ;;  %v54_v6 = vshrl.u32 %v1386_v3, 16  ;;  %v57_v7 = vshll.u32 %v1386_v3, 16  ;;  %v63_v8 = vshll.u32 %v1391_v4, 16  ;;  %v67_v9 = vshrl.u32 %v1391_v4, 16  ;;  %v1279_v10 = vld [vmem:[%s1646_s1 + $0x38] sm:$0xff]   ;;  %vm1426_vm2 = vmor %vm50_vm0, %vm51_vm1  ;;  %v1280_v33 = vld [vmem:[%s1646_s1] sm:$0xff]  }
   0x4   :  { %1153 = vmatprep.subr.bf16.mxu0 %v1277_v1  ;;  %v73_v11 = vshll.u32 %v1396_v5, 16  ;;  %v1409_v16 = vld [vmem:[%s1647_s0 + $0xc] sm:$0xf]  ;;  %v1414_v18 = vld [vmem:[%s1647_s0 + $0x10] sm:$0xf]  ;;  %v292_v45 = vrot.slane %v1391_v4, 5  ;;  %v995_v48 = vcombine.low %v1386_v3, %v1391_v4  ;;  %vm1463_vm6 = vmor %vm287_vm4, %vm288_vm5 }
   0x5   :  { %v56_v12 = vrot.slane %v54_v6, 4  ;;  %v59_v13 = vrot.slane %v57_v7, 5  ;;  %v65_v14 = vrot.slane %v63_v8, 5  ;;  %v69_v15 = vrot.slane %v67_v9, 4  ;;  %v1419_v19 = vld [vmem:[%s1647_s0 + $0x14] sm:$0x1]  ;;  %vm1055_vm10 = vmneg %vm432_vm7 }
   0x6   :  { %v75_v17 = vrot.slane %v73_v11, 5  ;;  %v78_v20 = vshrl.u32 %v1409_v16, 16  ;;  %v81_v23 = vshll.u32 %v1409_v16, 16  ;;  %v87_v24 = vshll.u32 %v1414_v18, 16  ;;  %v1281_v44 = vld [vmem:[%s1646_s1 + $0x8] sm:$0xff]   ;;  %v1290_v49 = vld [vmem:[%s1648_s2 + $0x40] sm:$0xff]  }
   0x7   :  { %1154 = vmatpush3.bf16.msra.mxu0 %v1277_v1  ;;  %v60_v21 = vor.u32 %v59_v13, %v56_v12  ;;  %v70_v22 = vor.u32 %v69_v15, %v65_v14  ;;  %v91_v27 = vshrl.u32 %v1414_v18, 16  ;;  %v97_v28 = vshll.u32 %v1419_v19, 16  ;;  %v1291_v52 = vld [vmem:[%s1648_s2 + $0x48] sm:$0xff]   ;;  %1187 = vmatprep.subr.bf16.mxu1 %v1290_v49  ;;  %v1292_v55 = vld [vmem:[%s1648_s2 + $0x50] sm:$0xff]   ;;  %v1283_v57 = vld [vmem:[%s1646_s1 + $0x18] sm:$0xff]  }
   0x8   :  { %1155 = vmatprep.subr.bf16.mxu0 %v1278_v2  ;;  %v80_v26 = vrot.slane %v78_v20, 4  ;;  %v83_v31 = vrot.slane %v81_v23, 5  ;;  %v89_v32 = vrot.slane %v87_v24, 5  ;;  %v295_v46 = vrot.slane %v1396_v5, 5  ;;  %v1282_v56 = vld [vmem:[%s1646_s1 + $0x10] sm:$0xff]   ;;  %1188 = vmatpush3.bf16.msra.mxu1 %v1290_v49  ;;  %v1285_v58 = vld [vmem:[%s1646_s1 + $0x40] sm:$0xff]  }
   0x9   :  { %v61_v29 = vrot.slane %v60_v21, 4  ;;  %v71_v30 = vrot.slane %v70_v22, 4  ;;  %v93_v34 = vrot.slane %v91_v27, 4  ;;  %v99_v40 = vrot.slane %v97_v28, 5  ;;  %1189 = vmatprep.subr.bf16.mxu1 %v1291_v52  ;;  %v1287_v63 = vld [vmem:[%s1646_s1 + $0x48] sm:$0xff]   ;;  %v1288_v1 = vld [vmem:[%s1646_s1 + $0x50] sm:$0xff]  }
   0xa   :  { %v84_v37 = vor.u32 %v83_v31, %v80_v26  ;;  %v1003_v51 = vrot.slane %v1386_v3, 9  ;;  %v294_v54 = vrot.slane %v292_v45, 4  ;;  %v996_v61 = vcombine.low %v1409_v16, %v1414_v18  ;;  %v1289_v5 = vld [vmem:[%s1646_s1 + $0x58] sm:$0xff]   ;;  %v1295_v11 = vld [vmem:[%s1648_s2 + $0x68] sm:$0xff]   ;;  %v1296_v12 = vld [vmem:[%s1648_s2 + $0x70] sm:$0xff]  }
   0xb   :  { %1156 = vmatpush3.bf16.msra.mxu0 %v1278_v2  ;;  %v66_v35 = vsel %vm1426_vm2, %v61_v29, %v65_v14  ;;  %v76_v36 = vsel %vm1426_vm2, %v71_v30, %v75_v17  ;;  %v94_v39 = vor.u32 %v93_v34, %v89_v32  ;;  %v299_v0 = vrot.slane %v1414_v18, 5  ;;  %v1293_v9 = vld [vmem:[%s1648_s2 + $0x58] sm:$0xff]   ;;  %v1527_v14 = vld [vmem:[%s1648_s2] sm:$0xff]   ;;  %v1314_v17 = vld [vmem:[%s1649_s3 + $0x10] sm:$0xff]  }
   0xc   :  { %1157 = vmatprep.subr.bf16.mxu0 %v1279_v10  ;;  %v1439_v38 = vcombine.low %v66_v35, %v76_v36  ;;  %v85_v41 = vrot.slane %v84_v37, 4  ;;  %1190 = vmatpush3.bf16.msra.mxu1 %v1291_v52  ;;  %v293_v59 = vsel %vm1463_vm6, %v1003_v51, %v292_v45  ;;  %v296_v60 = vsel %vm1463_vm6, %v294_v54, %v295_v46  ;;  %v1297_v13 = vld [vmem:[%s1648_s2 + $0x78] sm:$0xff]   ;;  %v1310_v15 = vld [vmem:[%s1649_s3] sm:$0xff]  }
   0xd   :  { %v95_v42 = vrot.slane %v94_v39, 4  ;;  %1191 = vmatprep.subr.bf16.mxu1 %v1292_v55  ;;  %v1013_v62 = vcombine.low %v293_v59, %v296_v60  ;;  %v302_v2 = vrot.slane %v1419_v19, 5  ;;  %v1004_v3 = vrot.slane %v1409_v16, 9  ;;  %v1312_v16 = vld [vmem:[%s1649_s3 + $0x8] sm:$0xff]   ;;  %v1316_v18 = vld [vmem:[%s1649_s3 + $0x18] sm:$0xff]  }
   0xe   :  { %1159 = vmatprep.mubr.msk.bf16.mxu0 %vm140_vm3, %v1439_v38  ;;  %v90_v43 = vsel %vm1426_vm2, %v85_v41, %v89_v32  ;;  %v301_v4 = vrot.slane %v299_v0, 4  ;;  %v1021_v19 = vld [vmem:[%s1650_s4] ss:$0 sm:$0xff]  ;;  %vm469_vm9 = vsmask.f32 7424  ;;  %vm1318_vm11 = vmmov 1  }
   0xf   :  { %1158 = vmatpush3.bf16.msra.mxu0 %v1279_v10  ;;  %v100_v47 = vsel %vm1426_vm2, %v95_v42, %v99_v40  ;;  %v300_v6 = vsel %vm1463_vm6, %v1004_v3, %v299_v0  ;;  %v1294_v10 = vld [vmem:[%s1648_s2 + $0x60] sm:$0xff]   ;;  %vm1568_vm12 = vmpackc.low %vm1318_vm11, %vm1055_vm10 }
  0x10   :  { %1163 = vmatprep.subr.bf16.mxu0 %v1280_v33  ;;  %v1457_v50 = vcombine.low %v90_v43, %v100_v47  ;;  %1192 = vmatpush3.bf16.msra.mxu1 %v1292_v55  ;;  %v303_v7 = vsel %vm1463_vm6, %v301_v4, %v302_v2  ;;  %v1022_v21 = vld [vmem:[%s1651_s5] ss:$0 sm:$0xff] }
  0x11   :  { %v1014_v8 = vcombine.low %v300_v6, %v303_v7  ;;  %1193 = vmatprep.subr.bf16.mxu1 %v1293_v9 }
  0x12   :  { %1160 = vmatmul.mubr.msk.bf16.vlgmr.msra.gmra.mrb[0].mxu0 %vm140_vm3, %v1457_v50 }
  0x13   :  { %1164 = vmatpush3.bf16.msra.mxu0 %v1280_v33  ;;  %1171 = vmatprep.mubr.msk.bf16.mxu0 %vm140_vm3, %v995_v48 }
  0x14   :  { %1165 = vmatprep.subr.bf16.mxu0 %v1281_v44  ;;  %1194 = vmatpush3.bf16.msra.mxu1 %v1293_v9 }
  0x15   :  { %1195 = vmatprep.subr.bf16.mxu1 %v1294_v10 }
  0x17   :  { %1166 = vmatpush3.bf16.msra.mxu0 %v1281_v44 }
  0x18   :  { %1167 = vmatprep.subr.bf16.mxu0 %v1282_v56  ;;  %1196 = vmatpush3.bf16.msra.mxu1 %v1294_v10  ;;  %v1299_v10 = vld [vmem:[%s1648_s2 + $0x8] sm:$0xff]  }
  0x19   :  { %1197 = vmatprep.subr.bf16.mxu1 %v1295_v11 }
  0x1b   :  { %1168 = vmatpush3.bf16.msra.mxu0 %v1282_v56 }
  0x1c   :  { %1169 = vmatprep.subr.bf16.mxu0 %v1283_v57  ;;  %1198 = vmatpush3.bf16.msra.mxu1 %v1295_v11  ;;  %v1300_v11 = vld [vmem:[%s1648_s2 + $0x10] sm:$0xff]  }
  0x1d   :  { %1199 = vmatprep.subr.bf16.mxu1 %v1296_v12 }
  0x1f   :  { %1170 = vmatpush3.bf16.msra.mxu0 %v1283_v57 }
  0x20   :  { %1175 = vmatprep.subr.bf16.mxu0 %v1285_v58  ;;  %1200 = vmatpush3.bf16.msra.mxu1 %v1296_v12  ;;  %v1301_v12 = vld [vmem:[%s1648_s2 + $0x18] sm:$0xff]  }
  0x21   :  { %1201 = vmatprep.subr.bf16.mxu1 %v1297_v13 }
  0x22   :  { %1172 = vmatmul.mubr.msk.bf16.vlgmr.msra.gmra.mrb[0].mxu0 %vm140_vm3, %v996_v61 }
  0x23   :  { %1176 = vmatpush3.bf16.msra.mxu0 %v1285_v58  ;;  %1183 = vmatprep.mubr.msk.bf16.mxu0 %vm140_vm3, %v1013_v62 }
  0x24   :  { %1177 = vmatprep.subr.bf16.mxu0 %v1287_v63  ;;  %1202 = vmatpush3.bf16.msra.mxu1 %v1297_v13  ;;  %v1302_v13 = vld [vmem:[%s1648_s2 + $0x20] sm:$0xff]  }
  0x25   :  { %1207 = vmatprep.subr.bf16.mxu1 %v1527_v14 }
  0x27   :  { %1178 = vmatpush3.bf16.msra.mxu0 %v1287_v63 }
  0x28   :  { %1179 = vmatprep.subr.bf16.mxu0 %v1288_v1 }
  0x2b   :  { %1180 = vmatpush3.bf16.msra.mxu0 %v1288_v1 }
  0x2c   :  { %1181 = vmatprep.subr.bf16.mxu0 %v1289_v5 }
  0x2f   :  { %1182 = vmatpush3.bf16.msra.mxu0 %v1289_v5 }
  0x30   :  { %1247 = vmatprep.subr.bf16.mxu0 %v1310_v15 }
  0x32   :  { %1184 = vmatmul.mubr.msk.bf16.vlgmr.msra.gmra.mrb[0].mxu0 %vm140_vm3, %v1014_v8 }
  0x33   :  { %1255 = vmatprep.mubr.msk.bf16.mxu0 %vm140_vm3, %v1439_v38  ;;  %1248 = vmatpush3.bf16.msra.mxu0 %v1310_v15  ;;  %v1304_v15 = vld [vmem:[%s1648_s2 + $0x30] sm:$0xff]  }
  0x34   :  { %1249 = vmatprep.subr.bf16.mxu0 %v1312_v16 }
  0x37   :  { %1250 = vmatpush3.bf16.msra.mxu0 %v1312_v16  ;;  %v1305_v16 = vld [vmem:[%s1648_s2 + $0x38] sm:$0xff]  }
  0x38   :  { %1251 = vmatprep.subr.bf16.mxu0 %v1314_v17 }
  0x3b   :  { %1252 = vmatpush3.bf16.msra.mxu0 %v1314_v17  ;;  %v1306_v17 = vld [vmem:[%s1648_s2 + $0x80] sm:$0xff]  }
  0x3c   :  { %1253 = vmatprep.subr.bf16.mxu0 %v1316_v18 }
  0x3f   :  { %1254 = vmatpush3.bf16.msra.mxu0 %v1316_v18  ;;  %v1307_v18 = vld [vmem:[%s1648_s2 + $0x88] sm:$0xff]  }
  0x42   :  { %1256 = vmatmul.mubr.msk.bf16.vlgmr.msra.gmra.mrb[4].mxu0 %vm140_vm3, %v1457_v50 }
 0x105   :  { %v1185_v20 = vpop.f32.mrb[0].mxu0 }
 0x106   :  { %v411_v22 = vmul.f32 %v1185_v20, %v1021_v19  ;;  %v383_v23 = vpop.f32.mrb[1].mxu0  ;;  %v1309_v20 = vld [vmem:[%s1648_s2 + $0x98] sm:$0xff]  }
 0x107   :  { %v409_v24 = vmul.f32 %v1021_v19, %v383_v23  ;;  %v1186_v25 = vpop.f32.mrb[2].mxu0  ;;  %v1315_v23 = vld [vmem:[%s1648_s2 + $0xb0] sm:$0xff]  }
 0x108   :  { %v422_v26 = vadd.f32 %v1022_v21, %v411_v22  ;;  %v412_v27 = vmul.f32 %v1186_v25, %v1021_v19  ;;  %v386_v28 = vpop.f32.mrb[3].mxu0  ;;  %v1313_v22 = vld [vmem:[%s1648_s2 + $0xa8] sm:$0xff]  }
 0x109   :  { %v420_v29 = vadd.f32 %v1022_v21, %v409_v24  ;;  %v410_v30 = vmul.f32 %v1021_v19, %v386_v28  ;;  %v1308_v19 = vld [vmem:[%s1648_s2 + $0x90] sm:$0xff]   ;;  %v1317_v24 = vld [vmem:[%s1648_s2 + $0xb8] sm:$0xff]  }
 0x10a   :  { %v426_v31 = vmax.f32 %v422_v26, 0.0  ;;  %v423_v32 = vadd.f32 %v1022_v21, %v412_v27 }
 0x10b   :  { %v424_v33 = vmax.f32 %v420_v29, 0.0  ;;  %v421_v34 = vadd.f32 %v1022_v21, %v410_v30  ;;  %v1311_v21 = vld [vmem:[%s1648_s2 + $0xa0] sm:$0xff]  }
 0x10c   :  { %v1550_v35 = vrot.slane %v426_v31, 7  ;;  %v427_v36 = vmax.f32 %v423_v32, 0.0  ;;  %v1095_v29 = vld [vmem:[%s1652_s8] ss:$0 sm:$0xff] }
 0x10d   :  { %v433_v37 = vrot.slane %v424_v33, 7  ;;  %v425_v38 = vmax.f32 %v421_v34, 0.0  ;;  %v1096_v31 = vld [vmem:[%s1653_s9] ss:$0 sm:$0xff] }
 0x10e   :  { %v437_v39 = vrot.slane %v427_v36, 7  ;;  %v446_v41 = vsel %vm432_vm7, 0.0, %v1550_v35  ;;  %v1087_v33 = vld [vmem:[%s1654_s6] ss:$0 sm:$0xff] }
 0x10f   :  { %v434_v40 = vrot.slane %v425_v38, 7  ;;  %v445_v42 = vsel %vm432_vm7, 0.0, %v433_v37 }
 0x110   :  { %v1557_v43 = vsel %vm432_vm7, %v1550_v35, %v437_v39  ;;  %v448_v44 = vsel %vm432_vm7, %v437_v39, 0.0 }
 0x111   :  { %v450_v45 = vpack.c.bf16 %v1557_v43, %v446_v41  ;;  %v468_v46 = vpack.c.bf16 %v448_v44, %v448_v44  ;;  %v1061_v47 = vpack.c.bf16 %v1557_v43, %v1550_v35  ;;  %v435_v48 = vsel %vm432_vm7, %v433_v37, %v434_v40  ;;  %v1088_v35 = vld [vmem:[%s1655_s7] ss:$0 sm:$0xff] }
 0x112   :  { %v447_v49 = vsel %vm432_vm7, %v434_v40, 0.0  ;;  %v449_v50 = vpack.c.bf16 %v435_v48, %v445_v42  ;;  %v1057_v51 = vpack.c.bf16 %v435_v48, %v433_v37 }
 0x113   :  { %v716_v52 = vrot.slane %v468_v46, 1  ;;  %v467_v53 = vpack.c.bf16 %v447_v49, %v447_v49  ;;  %v485_v54 = vshll.u32 %v450_v45, 16  ;;  %v483_v56 = vshrl.u32 %v450_v45, 16 }
 0x114   :  { %v473_v55 = vshll.u32 %v449_v50, 16  ;;  %v490_v57 = vshll.u32 %v468_v46, 16  ;;  %v712_v58 = vrot.slane %v449_v50, 1  ;;  %v715_v62 = vrot.slane %v450_v45, 1 }
 0x115   :  { %v478_v59 = vshll.u32 %v467_v53, 16  ;;  %v487_v60 = vrot.slane %v485_v54, 1  ;;  %v713_v61 = vrot.slane %v467_v53, 1  ;;  %v471_v63 = vshrl.u32 %v449_v50, 16  ;;  %v1257_v25 = vpop.f32.mrb[4].mxu0 }
 0x116   :  { %v475_v0 = vrot.slane %v473_v55, 1  ;;  %v492_v2 = vrot.slane %v490_v57, 1  ;;  %v717_v4 = vsel %vm711_vm8, %v715_v62, %v716_v52  ;;  %v926_v26 = vpop.f32.mrb[5].mxu0  ;;  %v950_v30 = vmul.f32 %v1257_v25, %v1095_v29 }
 0x117   :  { %v488_v1 = vor.u32 %v487_v60, %v483_v56  ;;  %v714_v3 = vsel %vm711_vm8, %v712_v58, %v713_v61  ;;  %v480_v6 = vrot.slane %v478_v59, 1  ;;  %v1258_v27 = vpop.f32.mrb[6].mxu0  ;;  %v948_v32 = vmul.f32 %v1095_v29, %v926_v26 }
 0x118   :  { %v476_v5 = vor.u32 %v475_v0, %v471_v63  ;;  %v929_v28 = vpop.f32.mrb[7].mxu0  ;;  %v961_v36 = vadd.f32 %v1096_v31, %v950_v30  ;;  %v951_v37 = vmul.f32 %v1258_v27, %v1095_v29 }
 0x119   :  { %v493_v7 = vsel %vm469_vm9, %v488_v1, %v492_v2  ;;  %v959_v40 = vadd.f32 %v1096_v31, %v948_v32  ;;  %v949_v41 = vmul.f32 %v1095_v29, %v929_v28 }
 0x11a   :  { %v481_v8 = vsel %vm469_vm9, %v476_v5, %v480_v6  ;;  %v962_v49 = vadd.f32 %v1096_v31, %v951_v37 }
 0x11b   :  { %1203 = vmatprep.mubr.bf16.mxu1 %v481_v8  ;;  %v960_v52 = vadd.f32 %v1096_v31, %v949_v41 }
 0x11c   :  { %1204 = vmatmul.mubr.bf16.vlgmr.msra.gmra.mrb[0].mxu1 %v493_v7 }
 0x11d   :  { %1208 = vmatpush3.bf16.msra.mxu1 %v1527_v14  ;;  %1223 = vmatprep.mubr.msk.bf16.mxu1 %vm1568_vm12, %v1057_v51  ;;  %v1303_v14 = vld [vmem:[%s1648_s2 + $0x28] sm:$0xff]  }
 0x11e   :  { %1209 = vmatprep.subr.bf16.mxu1 %v1299_v10 }
 0x121   :  { %1210 = vmatpush3.bf16.msra.mxu1 %v1299_v10 }
 0x122   :  { %1211 = vmatprep.subr.bf16.mxu1 %v1300_v11 }
 0x125   :  { %1212 = vmatpush3.bf16.msra.mxu1 %v1300_v11 }
 0x126   :  { %1213 = vmatprep.subr.bf16.mxu1 %v1301_v12 }
 0x129   :  { %1214 = vmatpush3.bf16.msra.mxu1 %v1301_v12 }
 0x12a   :  { %1215 = vmatprep.subr.bf16.mxu1 %v1302_v13 }
 0x12d   :  { %1216 = vmatpush3.bf16.msra.mxu1 %v1302_v13 }
 0x12e   :  { %1217 = vmatprep.subr.bf16.mxu1 %v1303_v14 }
 0x131   :  { %1218 = vmatpush3.bf16.msra.mxu1 %v1303_v14 }
 0x132   :  { %1219 = vmatprep.subr.bf16.mxu1 %v1304_v15 }
 0x135   :  { %1220 = vmatpush3.bf16.msra.mxu1 %v1304_v15 }
 0x136   :  { %1221 = vmatprep.subr.bf16.mxu1 %v1305_v16 }
 0x139   :  { %1222 = vmatpush3.bf16.msra.mxu1 %v1305_v16 }
 0x13a   :  { %1227 = vmatprep.subr.bf16.mxu1 %v1306_v17 }
 0x13c   :  { %1224 = vmatmul.mubr.msk.bf16.vlgmr.msra.gmra.mrb[0].mxu1 %vm1568_vm12, %v1061_v47 }
 0x13d   :  { %1228 = vmatpush3.bf16.msra.mxu1 %v1306_v17  ;;  %1243 = vmatprep.mubr.bf16.mxu1 %v714_v3 }
 0x13e   :  { %1229 = vmatprep.subr.bf16.mxu1 %v1307_v18 }
 0x141   :  { %1230 = vmatpush3.bf16.msra.mxu1 %v1307_v18 }
 0x142   :  { %1231 = vmatprep.subr.bf16.mxu1 %v1308_v19 }
 0x145   :  { %1232 = vmatpush3.bf16.msra.mxu1 %v1308_v19 }
 0x146   :  { %1233 = vmatprep.subr.bf16.mxu1 %v1309_v20 }
 0x149   :  { %1234 = vmatpush3.bf16.msra.mxu1 %v1309_v20 }
 0x14a   :  { %1235 = vmatprep.subr.bf16.mxu1 %v1311_v21 }
 0x14d   :  { %1236 = vmatpush3.bf16.msra.mxu1 %v1311_v21 }
 0x14e   :  { %1237 = vmatprep.subr.bf16.mxu1 %v1313_v22 }
 0x151   :  { %1238 = vmatpush3.bf16.msra.mxu1 %v1313_v22 }
 0x152   :  { %1239 = vmatprep.subr.bf16.mxu1 %v1315_v23 }
 0x155   :  { %1240 = vmatpush3.bf16.msra.mxu1 %v1315_v23 }
 0x156   :  { %1241 = vmatprep.subr.bf16.mxu1 %v1317_v24 }
 0x159   :  { %1242 = vmatpush3.bf16.msra.mxu1 %v1317_v24 }
 0x15c   :  { %1244 = vmatmul.mubr.bf16.vlgmr.msra.gmra.mrb[0].mxu1 %v717_v4 }
 0x22f   :  { %v1245_v34 = vpop.f32.mrb[0].mxu1 }
 0x230   :  { %v847_v38 = vmul.f32 %v1245_v34, %v1087_v33  ;;  %v819_v39 = vpop.f32.mrb[1].mxu1 }
 0x231   :  { %v845_v42 = vmul.f32 %v1087_v33, %v819_v39  ;;  %v1246_v43 = vpop.f32.mrb[2].mxu1 }
 0x232   :  { %v858_v44 = vadd.f32 %v1088_v35, %v847_v38  ;;  %v848_v45 = vmul.f32 %v1246_v43, %v1087_v33  ;;  %v822_v46 = vpop.f32.mrb[3].mxu1 }
 0x233   :  { %v856_v47 = vadd.f32 %v1088_v35, %v845_v42  ;;  %v846_v48 = vmul.f32 %v1087_v33, %v822_v46 }
 0x234   :  { %v965_v50 = vadd.f32 %v961_v36, %v858_v44  ;;  %v859_v51 = vadd.f32 %v1088_v35, %v848_v45 }
 0x235   :  { %v963_v53 = vadd.f32 %v959_v40, %v856_v47  ;;  %v857_v54 = vadd.f32 %v1088_v35, %v846_v48 }
 0x236   :  { %v969_v55 = vmax.f32 %v965_v50, 0.0  ;;  %v966_v56 = vadd.f32 %v962_v49, %v859_v51 }
 0x237   :  { %v967_v57 = vmax.f32 %v963_v53, 0.0  ;;  %v964_v58 = vadd.f32 %v960_v52, %v857_v54 }
 0x238   :  { %973 = vst [vmem:[%s1656_s10 + $0x10] sm:$0xff] %v969_v55  ;;  %v970_v59 = vmax.f32 %v966_v56, 0.0 }
 0x239   :  { %971 = vst [vmem:[%s1656_s10] sm:$0xff] %v967_v57  ;;  %v968_v60 = vmax.f32 %v964_v58, 0.0 }
 0x23a   :  { %974 = vst [vmem:[%s1656_s10 + $0x18] sm:$0xff] %v970_v59 }
 0x23b   :  { %972 = vst [vmem:[%s1656_s10 + $0x8] sm:$0xff] %v968_v60 }

</bundles_post_ra>
